<compile_context>
chip_gen: v7x
topology: tpu7x:2x2x1
jax: 0.10.0
libtpu: 0.0.40
codegen_flags: <defaults>
</compile_context>

<pallas_src>
import math

import jax
import jax.numpy as jnp
from jax.experimental import pallas as pl
from jax.experimental.pallas import tpu as pltpu


def _round_up(x, m):
    return ((x + m - 1) // m) * m


def _vmem_capacity_bytes():
    """Physical VMEM per core; falls back to 128 MiB (v5e/v6e) if unqueryable."""
    try:
        return int(pltpu.get_tpu_info().vmem_capacity_bytes)
    except Exception:
        return 128 * 1024 * 1024


def _hw_defaults():
    """(tile_m, tile_n, decode_tile_n, vmem_limit_bytes) tuned per generation."""
    cap = _vmem_capacity_bytes()
    vmem_limit = min(96 * 1024 * 1024, int(cap * 0.7))
    if cap <= 80 * 1024 * 1024:
        # v7x-class: 64 MiB physical VMEM, ~310 flop/byte ridge.
        return 512, 512, 1024, vmem_limit
    # v5e / v6e: 128 MiB physical VMEM; v6e ridge ~640 flop/byte needs tm>=768.
    return 1024, 512, 2048, vmem_limit


def _pick_tile_n(n_pad, target):
    """Largest multiple of 128 that divides n_pad and is <= target."""
    t = max(128, (min(target, n_pad) // 128) * 128)
    while t > 128:
        if n_pad % t == 0:
            return t
        t -= 128
    return 128


def qkv_kernel(x_ref, w_ref, b_ref, o_ref):
    # x_ref: (tm, K) bf16   w_ref: (K, tn) bf16   b_ref: (1, tn) f32   o_ref: (tm, tn)
    acc = jnp.dot(x_ref[...], w_ref[...], preferred_element_type=jnp.float32)
    o_ref[...] = (acc + b_ref[...].astype(jnp.float32)).astype(o_ref.dtype)


def fuse_qkv_params(wq, bq, wk, bk, wv, bv, *, param_dtype=jnp.bfloat16):
    """Fuse the three PyTorch-style (out//3, in) linears ONCE at init time.

    Returns (w_fused (K, N_pad) in param_dtype, b_fused (1, N_pad) f32, n_out).
    N is padded to a lane-aligned multiple of 128 so kernel stores are
    lane-dense / unmasked; padded columns are zero and sliced off later.
    """
    w = jnp.concatenate([wq, wk, wv], axis=0).T     # (K, N)
    b = jnp.concatenate([bq, bk, bv], axis=0)       # (N,)
    n = w.shape[1]
    n_pad = _round_up(n, 128)
    if n_pad != n:
        w = jnp.pad(w, ((0, 0), (0, n_pad - n)))
        b = jnp.pad(b, (0, n_pad - n))
    return w.astype(param_dtype), b[None, :].astype(jnp.float32), n


def qkv_forward(x, w_fused, b_fused, n_out, *, tile_m=None, tile_n=None,
                out_dtype=None):
    """x: (..., K). w_fused (K, N_pad) / b_fused (1, N_pad) from fuse_qkv_params."""
    k = x.shape[-1]
    assert w_fused.shape[0] == k, (w_fused.shape, k)
    n_pad = w_fused.shape[1]
    assert n_pad % 128 == 0, n_pad

    hw_tm, hw_tn, hw_decode_tn, vmem_limit = _hw_defaults()
    tile_m = hw_tm if tile_m is None else tile_m
    tile_n = hw_tn if tile_n is None else tile_n
    out_dtype = x.dtype if out_dtype is None else out_dtype

    lead = x.shape[:-1]
    m = math.prod(lead)
    # Cast activations to the (bf16) weight dtype inside the library: native
    # MXU dtype on v5e/v6e/v7x and half the HBM traffic. f32 accumulation
    # happens inside the kernel.
    x2d = x.reshape(m, k).astype(w_fused.dtype)

    in_isize = jnp.dtype(x2d.dtype).itemsize
    w_isize = jnp.dtype(w_fused.dtype).itemsize
    b_isize = jnp.dtype(b_fused.dtype).itemsize
    o_isize = jnp.dtype(out_dtype).itemsize

    # Row tile: round to 16 rows (bf16 packs two rows per sublane) and clamp
    # to the problem size.
    tm = min(tile_m, _round_up(m, 16))
    decode_like = m <= tm          # single row tile: pure weight streaming

    # Column tile: always a 128-multiple divisor of the (already 128-aligned)
    # padded N. Decode gets a wide tn -> fewer, larger weight DMAs.
    tn = _pick_tile_n(n_pad, hw_decode_tn if decode_like else tile_n)

    # Safety net: shrink tiles if the double-buffered working set would not
    # fit the scoped-VMEM budget (never triggers for bf16 at the defaults).
    def _fits(tm_, tn_):
        need = 2 * (tm_ * k * in_isize + k * tn_ * w_isize + tm_ * tn_ * o_isize
                    + tn_ * b_isize)
        return need <= int(0.9 * vmem_limit)

    while not _fits(tm, tn) and tm >= 256:
        tm //= 2
    while not _fits(tm, tn) and tn > 128:
        tn = _pick_tile_n(n_pad, tn - 128)

    m_pad = _round_up(m, tm)
    if m_pad != m:
        x2d = jnp.pad(x2d, ((0, m_pad - m), (0, 0)))

    grid_m = m_pad // tm
    grid_n = n_pad // tn

    # Pick the grid order that re-streams the cheaper operand.
    #   "mn": x resident per row tile, weight streamed grid_m times.
    #   "nm": weight tile resident, x streamed grid_n times.
    x_bytes = m_pad * k * in_isize
    w_bytes = k * n_pad * w_isize
    b_bytes = n_pad * b_isize
    out_bytes = m_pad * n_pad * o_isize
    bytes_mn = x_bytes + w_bytes * grid_m
    bytes_nm = x_bytes * grid_n + w_bytes
    if bytes_nm < bytes_mn:
        grid = (grid_n, grid_m)
        x_map = lambda j, i: (i, 0)
        w_map = lambda j, i: (0, j)
        b_map = lambda j, i: (0, j)
        o_map = lambda j, i: (i, j)
        bytes_accessed = bytes_nm + b_bytes + out_bytes
    else:
        grid = (grid_m, grid_n)
        x_map = lambda i, j: (i, 0)
        w_map = lambda i, j: (0, j)
        b_map = lambda i, j: (0, j)
        o_map = lambda i, j: (i, j)
        bytes_accessed = bytes_mn + b_bytes * grid_m + out_bytes

    cost = pl.CostEstimate(
        flops=2 * m_pad * k * n_pad,
        transcendentals=0,
        bytes_accessed=int(bytes_accessed),
    )

    out = pl.pallas_call(
        qkv_kernel,
        out_shape=jax.ShapeDtypeStruct((m_pad, n_pad), out_dtype),
        grid_spec=pltpu.PrefetchScalarGridSpec(
            num_scalar_prefetch=0,
            grid=grid,
            in_specs=[
                pl.BlockSpec((tm, k), x_map),    # x row tile, full K
                pl.BlockSpec((k, tn), w_map),    # weight column tile, full K
                pl.BlockSpec((1, tn), b_map),    # bias column tile (~2 KiB)
            ],
            out_specs=pl.BlockSpec((tm, tn), o_map),
        ),
        compiler_params=pltpu.CompilerParams(
            dimension_semantics=("parallel", "parallel"),
            vmem_limit_bytes=int(vmem_limit),
        ),
        cost_estimate=cost,
    )(x2d, w_fused, b_fused)

    out = out[:m, :n_out]
    return out.reshape(*lead, n_out)


def init_params(key, in_features, out_features):
    """Deterministic PyTorch-Linear-style init for the three projections."""
    d = out_features // 3
    bound = 1.0 / jnp.sqrt(jnp.float32(in_features))
    keys = jax.random.split(key, 6)
    wq = jax.random.uniform(keys[0], (d, in_features), jnp.float32, -bound, bound)
    bq = jax.random.uniform(keys[1], (d,), jnp.float32, -bound, bound)
    wk = jax.random.uniform(keys[2], (d, in_features), jnp.float32, -bound, bound)
    bk = jax.random.uniform(keys[3], (d,), jnp.float32, -bound, bound)
    wv = jax.random.uniform(keys[4], (d, in_features), jnp.float32, -bound, bound)
    bv = jax.random.uniform(keys[5], (d,), jnp.float32, -bound, bound)
    return wq, bq, wk, bk, wv, bv


if __name__ == "__main__":
    key = jax.random.PRNGKey(0)
    batch, seq, in_features, out_features = 2, 8, 32, 96

    k_x, k_p = jax.random.split(key)
    x = jax.random.normal(k_x, (batch, seq, in_features), jnp.float32)
    wq, bq, wk, bk, wv, bv = init_params(k_p, in_features, out_features)

    # Fuse + pad + bf16-cast the weights ONCE (parameter-init time).
    w_fused, b_fused, n_out = fuse_qkv_params(wq, bq, wk, bk, wv, bv)

    out = qkv_forward(x, w_fused, b_fused, n_out)
    out = jax.block_until_ready(out)

    # Pure-JAX reference matching the kernel's numerics: bf16 operands,
    # f32 accumulation, f32 bias add (the module itself is torch-f32; the
    # bf16 cast is the kernel's MXU-native compute dtype).
    xb = x.astype(jnp.bfloat16).astype(jnp.float32)
    q = xb @ wq.astype(jnp.bfloat16).astype(jnp.float32).T + bq
    kk = xb @ wk.astype(jnp.bfloat16).astype(jnp.float32).T + bk
    v = xb @ wv.astype(jnp.bfloat16).astype(jnp.float32).T + bv
    ref = jnp.concatenate([q, kk, v], axis=-1)

    assert out.shape == (batch, seq, out_features), out.shape
    err = float(jnp.abs(out - ref).max())
    assert jnp.allclose(out, ref, atol=1e-4, rtol=1e-4), err
    print("KERNEL_OK")
</pallas_src>

<mosaic_0001>
module attributes {stable_mosaic.version = 11 : i64} {
  func.func @qkv_kernel(%arg0: i32, %arg1: i32, %arg2: memref<16x32xbf16, #tpu.memory_space<vmem>>, %arg3: memref<32x128xbf16, #tpu.memory_space<vmem>>, %arg4: memref<1x128xf32, #tpu.memory_space<vmem>>, %arg5: memref<16x128xf32, #tpu.memory_space<vmem>>) attributes {dimension_semantics = [#tpu.dimension_semantics<parallel>, #tpu.dimension_semantics<parallel>], iteration_bounds = array<i64: 1, 1>, scalar_prefetch = 0 : i64, scratch_operands = 0 : i64, tpu.core_type = #tpu.core_type<tc>, window_params = [{transform_indices = @transform_0, window_bounds = array<i64: 16, 32>}, {transform_indices = @transform_1, window_bounds = array<i64: 32, 128>}, {transform_indices = @transform_2, window_bounds = array<i64: 1, 128>}, {transform_indices = @transform_3, window_bounds = array<i64: 16, 128>}]} {
    %c0 = arith.constant 0 : index
    %c0_0 = arith.constant 0 : index
    %0 = vector.load %arg2[%c0, %c0_0] : memref<16x32xbf16, #tpu.memory_space<vmem>>, vector<16x32xbf16>
    %c0_1 = arith.constant 0 : index
    %c0_2 = arith.constant 0 : index
    %1 = vector.load %arg3[%c0_1, %c0_2] : memref<32x128xbf16, #tpu.memory_space<vmem>>, vector<32x128xbf16>
    %cst = arith.constant dense<0.000000e+00> : vector<16x128xf32>
    %2 = tpu.matmul %0, %1, %cst {dimension_numbers = #tpu.dot_dimension_numbers<[1], [0], [0], [1], [0, 0, 1, 1], [], []>} : vector<16x32xbf16>, vector<32x128xbf16>, vector<16x128xf32> -> vector<16x128xf32>
    %c0_3 = arith.constant 0 : index
    %c0_4 = arith.constant 0 : index
    %3 = vector.load %arg4[%c0_3, %c0_4] : memref<1x128xf32, #tpu.memory_space<vmem>>, vector<1x128xf32>
    %4 = vector.broadcast %3 : vector<1x128xf32> to vector<16x128xf32>
    %5 = arith.addf %2, %4 : vector<16x128xf32>
    %c0_5 = arith.constant 0 : index
    %c0_6 = arith.constant 0 : index
    %6 = vector.load %arg5[%c0_5, %c0_6] : memref<16x128xf32, #tpu.memory_space<vmem>>, vector<16x128xf32>
    tpu.vector_store %arg5[%c0_5, %c0_6], %5 {strides = array<i32>} : memref<16x128xf32, #tpu.memory_space<vmem>>, vector<16x128xf32>,
    return
  }
  func.func @transform_0(%arg0: i32, %arg1: i32) -> (i32, i32) {
    %c0_i32 = arith.constant 0 : i32
    %c0_i32_0 = arith.constant 0 : i32
    return %arg0, %c0_i32 : i32, i32
  }
  func.func @transform_1(%arg0: i32, %arg1: i32) -> (i32, i32) {
    %c0_i32 = arith.constant 0 : i32
    %c0_i32_0 = arith.constant 0 : i32
    return %c0_i32, %arg1 : i32, i32
  }
  func.func @transform_2(%arg0: i32, %arg1: i32) -> (i32, i32) {
    %c0_i32 = arith.constant 0 : i32
    %c0_i32_0 = arith.constant 0 : i32
    return %c0_i32, %arg1 : i32, i32
  }
  func.func @transform_3(%arg0: i32, %arg1: i32) -> (i32, i32) {
    %c0_i32 = arith.constant 0 : i32
    return %arg0, %arg1 : i32, i32
  }
}

</mosaic_0001>

<bundles_post_ra>
// kernel: tpu_custom_call.1
= control target key start
LH: loop header
LB: loop body
LE: loop exit
PB: predicated region body
PF: predicated region fallthrough
CT: control target
= control target key end

     0   :  { %8 = vsyncpa [#allocation3], 0  ;;  %s358_s0 = inlined_call_operand.hbm [shape: bf16[16,32], index: 0, kind: input, shape index: {}]   ;;  %s359_s1 = inlined_call_operand.hbm [shape: bf16[32,128], index: 1, kind: input, shape index: {}]   ;;  %s360_s2 = inlined_call_operand.hbm [shape: f32[1,128], index: 2, kind: input, shape index: {}]   ;;  %s361_s3 = inlined_call_operand.hbm [shape: f32[16,128], index: 3, kind: output, shape index: {}]  }
   0x1   :  { %9 = vsyncpa [#allocation6], 0 }
   0x2   :  { %10 = vsyncpa [#allocation4], 0  ;;  %s273_s12 = smov [#allocation5]   ;;  %s274_s14 = smov [#allocation2]  }
   0x3   :  { %s28_s13 = sshll.u32 %s273_s12, 4  ;;  %s16_s15 = sshll.u32 %s274_s14, 4  ;;  %s29_s13 = int_to_ptr.vmem [resolvable:$true] %s28_s13  ;;  %s303_s15 = int_to_ptr.vmem [resolvable:$true] %s16_s15 }
   0x4   :  { %s179_s18 = scalar_lea.hbm %s359_s1, 256 }
   0x5   :  { %p180_p0 = scmp.ne.s32.totalorder %s359_s1, %s179_s18  ;;  %p183_p1 = scmp.lt.u32.totalorder %s179_s18, %s359_s1 }
   0x7   :  { %p185_p2 = pnand %p183_p1, %p180_p0 }
   0x9   :  { %188 = shalt.err (!%p185_p2)
}
   0xa   :  { %s189_s23 = scalar_lea.vmem %s29_s13, 256  ;;  %p194_p4 = scmp.lt.s32.totalorder %s29_s13, %s29_s13 }
   0xb   :  { %p190_p3 = scmp.ne.s32.totalorder %s29_s13, %s189_s23  ;;  %p195_p5 = scmp.lt.s32.totalorder %s189_s23, %s189_s23 }
   0xd   :  { %p196_p6 = por %p195_p5, %p194_p4 }
   0xf   :  { %p197_p7 = pnand %p196_p6, %p190_p3 }
  0x11   :  { %200 = shalt.err (!%p197_p7)
}
  0x12   :  { %s275_s24 = smov 64   ;;  %s276_s25 = smov 4  }
  0x13   :  { %34 = dma.hbm_to_vmem [thread:$0]  %s359_s1, 256, %s29_s13, [#allocation6], %s275_s24, %s275_s24, %s276_s25  }
  0x14   :  { %s201_s30 = scalar_lea.hbm %s358_s0, 128 }
  0x15   :  { %p202_p8 = scmp.ne.s32.totalorder %s358_s0, %s201_s30  ;;  %p205_p9 = scmp.lt.u32.totalorder %s201_s30, %s358_s0 }
  0x17   :  { %p207_p10 = pnand %p205_p9, %p202_p8 }
  0x19   :  { %210 = shalt.err (!%p207_p10)
}
  0x1a   :  { %s211_s8 = scalar_lea.vmem %s303_s15, 128  ;;  %p216_p12 = scmp.lt.s32.totalorder %s303_s15, %s303_s15 }
  0x1b   :  { %p212_p11 = scmp.ne.s32.totalorder %s303_s15, %s211_s8  ;;  %p217_p13 = scmp.lt.s32.totalorder %s211_s8, %s211_s8 }
  0x1d   :  { %p218_p0 = por %p217_p13, %p216_p12 }
  0x1f   :  { %p219_p1 = pnand %p218_p0, %p212_p11 }
  0x21   :  { %222 = shalt.err (!%p219_p1)
}
  0x22   :  { %22 = dma.hbm_to_vmem [thread:$0]  %s358_s0, 128, %s303_s15, [#allocation3], %s275_s24, %s275_s24, %s276_s25  }
  0x23   :  { %s277_s10 = smov [#allocation7]   ;;  %s223_s14 = scalar_lea.hbm %s360_s2, 16 }
  0x24   :  { %s41_s11 = sshll.u32 %s277_s10, 4  ;;  %p224_p2 = scmp.ne.s32.totalorder %s360_s2, %s223_s14  ;;  %s42_s11 = int_to_ptr.vmem [resolvable:$true] %s41_s11 }
  0x25   :  { %p227_p3 = scmp.lt.u32.totalorder %s223_s14, %s360_s2 }
  0x27   :  { %p229_p4 = pnand %p227_p3, %p224_p2 }
  0x29   :  { %232 = shalt.err (!%p229_p4)
}
  0x2a   :  { %s233_s20 = scalar_lea.vmem %s42_s11, 16  ;;  %s237_s0 = scalar_lea.vmem %s42_s11, 32 }
  0x2b   :  { %p234_p5 = scmp.ne.s32.totalorder %s42_s11, %s233_s20  ;;  %p238_p6 = scmp.lt.s32.totalorder %s42_s11, %s42_s11 }
  0x2c   :  { %p239_p7 = scmp.lt.s32.totalorder %s237_s0, %s233_s20 }
  0x2e   :  { %p240_p8 = por %p239_p7, %p238_p6 }
  0x30   :  { %p241_p9 = pnand %p240_p8, %p234_p5 }
  0x32   :  { %244 = shalt.err (!%p241_p9)
}
  0x33   :  { %44 = dma.hbm_to_vmem [thread:$0]  %s360_s2, 16, %s42_s11, [#allocation6]  }
  0x34   :  { %267 = dma.done.wait [#allocation3], 128  }
  0x35   :  { %268 = vsyncadd [#allocation3], 4294967168 }
  0x36   :  { %269 = dma.done.wait [#allocation6], 272  }
  0x37   :  { %270 = vsyncadd [#allocation6], 4294967024  ;;  %v278_v0 = vmov 0.0   ;;  %vm279_vm0 = vmmov 0   ;;  %v176_v1 = vld [vmem:[#allocation5] sm:$0xff]   ;;  %v177_v2 = vld [vmem:[#allocation5 + $0x8] sm:$0xff]  }
  0x38   :  { %158 = vmatprep.subr.bf16.mxu0 %v278_v0  ;;  %162 = vmatprep.mubr.msk.bf16.mxu0 %vm279_vm0, %v278_v0  ;;  %v178_v3 = vld [vmem:[#allocation2] sm:$0xff]   ;;  %vm85_vm1 = vcmask 261120   ;;  %v150_v4 = vld [vmem:[#allocation7] ss:$0 sm:$0xff]  ;;  %s280_s22 = smov [#allocation8]  }
  0x39   :  { %159 = vmatpush3.bf16.msra.mxu0 %v176_v1  ;;  %s137_s23 = sshll.u32 %s280_s22, 4  ;;  %s138_s23 = int_to_ptr.vmem [resolvable:$true] %s137_s23 }
  0x3a   :  { %160 = vmatprep.subr.bf16.mxu0 %v278_v0  ;;  %s245_s2 = scalar_lea.vmem %s138_s23, 256  ;;  %p250_p11 = scmp.lt.s32.totalorder %s138_s23, %s138_s23 }
  0x3b   :  { %p246_p10 = scmp.ne.s32.totalorder %s138_s23, %s245_s2  ;;  %p251_p12 = scmp.lt.s32.totalorder %s245_s2, %s245_s2 }
  0x3d   :  { %161 = vmatpush3.bf16.msra.mxu0 %v177_v2  ;;  %p252_p13 = por %p251_p12, %p250_p11 }
  0x3f   :  { %p253_p0 = pnand %p252_p13, %p246_p10 }
  0x40   :  { %163 = vmatmul.mubr.msk.bf16.vlgmr.msra.gmra.mrb[0].mxu0 %vm85_vm1, %v178_v3 }
 0x113   :  { %v123_v5 = vpop.f32.mrb[0].mxu0 }
 0x114   :  { %v124_v6 = vadd.f32 %v150_v4, %v123_v5  ;;  %v164_v7 = vpop.f32.mrb[1].mxu0 }
 0x115   :  { %v126_v8 = vpop.f32.mrb[2].mxu0 }
 0x116   :  { %130 = vst [vmem:[#allocation8] sm:$0xff] %v124_v6  ;;  %v127_v9 = vadd.f32 %v150_v4, %v126_v8  ;;  %v165_v10 = vpop.f32.mrb[3].mxu0 }
 0x118   :  { %131 = vst [vmem:[#allocation8 + $0x8] sm:$0xff] %v127_v9 }
 0x119   :  { %256 = shalt.err (!%p253_p0)
}
 0x11a   :  { %s257_s26 = scalar_lea.hbm %s361_s3, 256 }
 0x11b   :  { %p258_p1 = scmp.ne.s32.totalorder %s361_s3, %s257_s26  ;;  %p261_p2 = scmp.lt.u32.totalorder %s257_s26, %s361_s3 }
 0x11d   :  { %p263_p3 = pnand %p261_p2, %p258_p1 }
 0x11f   :  { %266 = shalt.err (!%p263_p3)
}
 0x120   :  { %s281_s4 = smov 128   ;;  %s282_s5 = smov 8  }
 0x121   :  { %143 = dma.vmem_to_hbm [thread:$0]  %s138_s23, 256, %s361_s3, [#allocation4], %s281_s4, %s281_s4, %s282_s5  }
 0x122   :  { %271 = dma.done.wait [#allocation4], 256  }
 0x123   :  { %272 = vsyncadd [#allocation4], 4294967040 }
 0x124   :  { %147 = vsyncpa [#allocation3], 1 }
 0x125   :  { %148 = vsyncpa [#allocation6], 1 }
 0x126   :  { %149 = vsyncpa [#allocation4], 1 }

</bundles_post_ra>
